<compile_context>
chip_gen: v7x
topology: tpu7x:2x2x1
jax: 0.10.0
libtpu: 0.0.40
codegen_flags: <defaults>
</compile_context>

<pallas_src>
import functools

import jax
import jax.numpy as jnp
from jax.experimental import pallas as pl
from jax.experimental.pallas import tpu as pltpu

NHEAD = 8          # hard-coded in TransformerDecoderLayerOptimal
LN_EPS = 1e-5      # layer_norm_eps


def _layernorm(x, g, b):
    mu = jnp.mean(x, axis=-1, keepdims=True)
    xc = x - mu
    var = jnp.mean(xc * xc, axis=-1, keepdims=True)
    return xc * jax.lax.rsqrt(var + LN_EPS) * g + b


def _vmem_limit_bytes():
    # 0.75 * physical capped at 96 MiB: 128 MiB parts (v5e/v6e) -> 96 MiB,
    # v7x's 64 MiB parts -> 48 MiB.  Explicit fallback so AOT / mock compiles
    # don't fall back to the tiny scoped-VMEM defaults.
    cap = 96 * 1024 * 1024
    try:
        phys = pltpu.get_tpu_info().vmem_capacity_bytes
    except Exception:
        phys = 128 * 1024 * 1024
    return int(min(cap, phys * 3 // 4))


def _const_spec(shape, single_buffer=False):
    # Block that is identical on every grid step.  single_buffer=True avoids
    # double-buffering grid-invariant weights (saves ~half their VMEM).
    n = len(shape)
    idx = lambda *_, _n=n: (0,) * _n
    if single_buffer:
        try:
            return pl.BlockSpec(shape, idx, pipeline_mode=pl.Buffered(1))
        except (TypeError, AttributeError):
            pass
    return pl.BlockSpec(shape, idx)


# --------------------------------------------------------------------------- #
# Kernel 1: embed_standart + ReLU, NCHW->token transpose folded into the dot. #
# --------------------------------------------------------------------------- #
def embed_relu_kernel(x_ref, w_ref, b_ref, o_ref):
    # x_ref: (1, C, TS) block of the natural NCHW feature map.  Contracting
    # over C (lhs dim 0) folds flatten(2).transpose(1, 2) into the matmul.
    # (Transposed-LHS MXU path; if a vxpose ever shows up in the MLIR, switch
    # to a C-reduction grid with (TS, C)-oriented blocks.)
    acc = jax.lax.dot_general(
        x_ref[0].astype(jnp.bfloat16), w_ref[...], (((0,), (0,)), ((), ())),
        preferred_element_type=jnp.float32)                      # (TS, D) f32
    o_ref[0] = jnp.maximum(acc + b_ref[...], 0.0).astype(o_ref.dtype)


def _pick_seq_tile(S):
    for t in (512, 256, 128):                 # lane-aligned tiles when possible
        if S % t == 0:
            return t
    return S                                   # small/odd S: whole sequence


def embed_relu(x3, w_bf16, b_row):
    # x3: (bs, C, S) f32   w: (C, D) bf16   b: (1, D) f32   -> (bs, S, D) bf16
    bs, C, S = x3.shape
    D = w_bf16.shape[1]
    TS = _pick_seq_tile(S)
    return pl.pallas_call(
        embed_relu_kernel,
        out_shape=jax.ShapeDtypeStruct((bs, S, D), jnp.bfloat16),
        grid=(bs, S // TS),
        in_specs=[pl.BlockSpec((1, C, TS), lambda bi, si: (bi, 0, si)),
                  _const_spec((C, D), single_buffer=True),
                  _const_spec((1, D), single_buffer=True)],
        out_specs=pl.BlockSpec((1, TS, D), lambda bi, si: (bi, si, 0)),
        compiler_params=pltpu.CompilerParams(
            dimension_semantics=("parallel", "parallel"),
            vmem_limit_bytes=_vmem_limit_bytes()),
    )(x3, w_bf16, b_row)


# --------------------------------------------------------------------------- #
# Kernel 2a: batch-invariant query prep (run once, not once per batch item).  #
#   tgt1 = layernorm(query + dropout1(query)); q[h] = (tgt1 @ Wq_h + bq_h)/√hd #
# --------------------------------------------------------------------------- #
def query_prep_kernel(query_ref, g1_ref, be1_ref, wq_ref, bq_ref,
                      tgt1_ref, q3_ref, *, scale):
    # eval mode only: tgt + dropout1(tgt) == 2 * tgt
    tgt = query_ref[...] * 2.0
    tgt = _layernorm(tgt, g1_ref[...], be1_ref[...])
    tgt1_ref[...] = tgt
    tgt_b = tgt.astype(jnp.bfloat16)
    for h in range(NHEAD):                       # heads on the leading axis
        qh = jnp.dot(tgt_b, wq_ref[h],
                     preferred_element_type=jnp.float32) + bq_ref[h]
        q3_ref[h] = (qh * scale).astype(jnp.bfloat16)     # 1/sqrt(hd) folded in


def query_prep(pp):
    K, D = pp['query'].shape
    hd = D // NHEAD
    scale = 1.0 / float(hd) ** 0.5
    cs = _const_spec
    return pl.pallas_call(
        functools.partial(query_prep_kernel, scale=scale),
        out_shape=(jax.ShapeDtypeStruct((K, D), jnp.float32),
                   jax.ShapeDtypeStruct((NHEAD, K, hd), jnp.bfloat16)),
        grid=(1,),
        in_specs=[cs((K, D)), cs((1, D)), cs((1, D)),
                  cs((NHEAD, D, hd)), cs((NHEAD, 1, hd))],
        out_specs=(cs((K, D)), cs((NHEAD, K, hd))),
    )(pp['query'], pp['g1'], pp['be1'], pp['wq_h'], pp['bq_h'])


# --------------------------------------------------------------------------- #
# Kernel 2b: TransformerDecoderLayerOptimal (eval mode), TB batch items/step. #
# --------------------------------------------------------------------------- #
def decoder_layer_kernel(tgt1_ref, q3_ref, mem_ref,
                         wk_ref, bk_ref, wv_ref, bv_ref, wo_ref, bo_ref,
                         g2_ref, be2_ref, g3_ref, be3_ref,
                         w1_ref, b1_ref, w2_ref, b2_ref,
                         h_ref, heads_sc, *, TB, S):
    K = tgt1_ref.shape[0]
    q3 = q3_ref[...]                                   # (H, K, hd) bf16, scaled

    # ---- attention: k/v projected per (batch, head); per-head outputs go to
    #      a VMEM scratch (bounds live ranges; no lane concat) ----
    for b in range(TB):
        mem_b = mem_ref[b * S:(b + 1) * S, :]          # (S, D) bf16, 8-aligned
        for h in range(NHEAD):
            kh = jnp.dot(mem_b, wk_ref[h],
                         preferred_element_type=jnp.float32) + bk_ref[h]  # (S, hd)
            vh = jnp.dot(mem_b, wv_ref[h],
                         preferred_element_type=jnp.float32) + bv_ref[h]
            s = jax.lax.dot_general(
                q3[h], kh.astype(jnp.bfloat16), (((1,), (1,)), ((), ())),
                preferred_element_type=jnp.float32)                       # (K, S)
            s = s - jnp.max(s, axis=-1, keepdims=True)
            p = jnp.exp(s)
            p = p * pl.reciprocal(jnp.sum(p, axis=-1, keepdims=True),
                                  approx=True)
            heads_sc[h, b * K:(b + 1) * K, :] = jnp.dot(
                p.astype(jnp.bfloat16), vh.astype(jnp.bfloat16),
                preferred_element_type=jnp.float32).astype(jnp.bfloat16)  # (K, hd)

    # ---- out-projection: one tall (TB*K, hd) @ (hd, D) matmul per head ----
    attn = jnp.dot(heads_sc[0], wo_ref[0], preferred_element_type=jnp.float32)
    for h in range(1, NHEAD):
        attn = attn + jnp.dot(heads_sc[h], wo_ref[h],
                              preferred_element_type=jnp.float32)
    attn = attn + bo_ref[...]                                    # (TB*K, D)

    tgt1 = tgt1_ref[...]
    if TB > 1:
        tgt1 = jnp.concatenate([tgt1] * TB, axis=0)              # (TB*K, D)
    tgt2 = _layernorm(tgt1 + attn, g2_ref[...], be2_ref[...])

    # ---- FFN over all TB*K rows in one tall matmul ----
    hid = jnp.maximum(
        jnp.dot(tgt2.astype(jnp.bfloat16), w1_ref[...],
                preferred_element_type=jnp.float32) + b1_ref[...], 0.0)
    ff = jnp.dot(hid.astype(jnp.bfloat16), w2_ref[...],
                 preferred_element_type=jnp.float32) + b2_ref[...]
    h_ref[...] = _layernorm(tgt2 + ff, g3_ref[...], be3_ref[...])


def _pick_tb(bs, max_tb):
    # Largest divisor of bs that still leaves >= 2 grid steps (megacore /
    # DMA pipelining); bs == 1 degenerates to a single step.
    tb = 1
    for t in range(1, min(bs, max_tb) + 1):
        if bs % t == 0 and (bs // t) >= 2:
            tb = t
    return tb


def decoder_layer(pp, tgt1, q3, memory, *, max_tb=4):
    # max_tb=4 keeps >= 2 parallel grid steps for v7x's two TensorCores and
    # bounds per-step VMEM; v5e/v6e (single TC, 128 MiB VMEM) may raise to 8.
    bs, S, D = memory.shape
    K = tgt1.shape[0]
    hd = D // NHEAD
    F = pp['w1'].shape[1]
    TB = _pick_tb(bs, max_tb)

    mem2 = memory.reshape(bs * S, D)             # metadata-only reshape

    cs = lambda shape: _const_spec(shape, single_buffer=True)
    in_specs = [cs((K, D)), cs((NHEAD, K, hd)),
                pl.BlockSpec((TB * S, D), lambda b: (b, 0)),
                cs((NHEAD, D, hd)), cs((NHEAD, 1, hd)),
                cs((NHEAD, D, hd)), cs((NHEAD, 1, hd)),
                cs((NHEAD, hd, D)), cs((1, D)),
                cs((1, D)), cs((1, D)), cs((1, D)), cs((1, D)),
                cs((D, F)), cs((1, F)), cs((F, D)), cs((1, D))]

    out2 = pl.pallas_call(
        functools.partial(decoder_layer_kernel, TB=TB, S=S),
        out_shape=jax.ShapeDtypeStruct((bs * K, D), jnp.float32),
        grid=(bs // TB,),
        in_specs=in_specs,
        out_specs=pl.BlockSpec((TB * K, D), lambda b: (b, 0)),
        scratch_shapes=[pltpu.VMEM((NHEAD, TB * K, hd), jnp.bfloat16)],
        compiler_params=pltpu.CompilerParams(
            dimension_semantics=("parallel",),
            vmem_limit_bytes=_vmem_limit_bytes()),
    )(tgt1, q3, mem2,
      pp['wk_h'], pp['bk_h'], pp['wv_h'], pp['bv_h'], pp['wo_h'], pp['bo'],
      pp['g2'], pp['be2'], pp['g3'], pp['be3'],
      pp['w1'], pp['b1'], pp['w2'], pp['b2'])
    # TODO(synk): on v7x with very large F, split attention and FFN into two
    # pallas_calls (or stream w1/w2 in F-chunks) so w1+w2 aren't resident
    # during the attention phase.
    return out2.reshape(bs, K, D)                # metadata-only reshape


# --------------------------------------------------------------------------- #
# Kernel 3: GroupFC  out[b, k*dup:(k+1)*dup] = h[b, k, :] @ W[k]^T (+ bias)    #
# --------------------------------------------------------------------------- #
def group_fc_kernel(h_ref, w_ref, b_ref, o_ref):
    # h_ref: (bs, TK, D)  w_ref: (TK, dup, D)  (D = lane dim -> no lane pad)
    # o_ref: (bs, TK*dup) lane-dense slab with the bias fused.
    h = h_ref[...].astype(jnp.bfloat16)
    TK = w_ref.shape[0]
    parts = [jax.lax.dot_general(h[:, t, :], w_ref[t],
                                 (((1,), (1,)), ((), ())),
                                 preferred_element_type=jnp.float32)
             for t in range(TK)]
    o_ref[...] = jnp.concatenate(parts, axis=-1) + b_ref[...]


def _pick_group_tile(K, dup):
    # Prefer a tile whose output slab is lane-dense (multiple of 128 wide).
    for t in range(min(K, 32), 7, -1):
        if K % t == 0 and t % 8 == 0 and (t * dup) % 128 == 0:
            return t
    return K


def group_fc(h, w_t, bias_pad):
    # h: (bs, K, D) f32   w_t: (K, dup, D) bf16   bias_pad: (1, K*dup) f32
    bs, K, D = h.shape
    dup = w_t.shape[1]
    TK = _pick_group_tile(K, dup)
    return pl.pallas_call(
        group_fc_kernel,
        out_shape=jax.ShapeDtypeStruct((bs, K * dup), jnp.float32),
        grid=(K // TK,),
        in_specs=[pl.BlockSpec((bs, TK, D), lambda i: (0, i, 0)),
                  pl.BlockSpec((TK, dup, D), lambda i: (i, 0, 0)),
                  pl.BlockSpec((1, TK * dup), lambda i: (0, i))],
        out_specs=pl.BlockSpec((bs, TK * dup), lambda i: (0, i)),
        compiler_params=pltpu.CompilerParams(
            dimension_semantics=("parallel",)),
    )(h, w_t, bias_pad)
    # TODO(synk): optionally fuse GroupFC into the decoder kernel's epilogue
    # to skip the h (bs, K, D) HBM round trip (biggest relative win on v5e).


# --------------------------------------------------------------------------- #
# Parameter init (PyTorch layouts) + one-time kernel-layout preparation       #
# --------------------------------------------------------------------------- #
def init_params(key, *, num_classes, K, D, C, F, dup):
    ks = jax.random.split(key, 12)
    n = lambda k, s, scale=1.0: jax.random.normal(k, s, jnp.float32) * scale
    p = {}
    p['w_e'] = n(ks[0], (C, D), 1.0 / C ** 0.5)          # embed_standart (in, out)
    p['b_e'] = n(ks[1], (D,), 0.02)
    p['query'] = n(ks[2], (K, D))                        # nn.Embedding weight
    p['wq'] = n(ks[3], (D, D), 1.0 / D ** 0.5)
    p['wk'] = n(ks[4], (D, D), 1.0 / D ** 0.5)
    p['wv'] = n(ks[5], (D, D), 1.0 / D ** 0.5)
    p['wo'] = n(ks[6], (D, D), 1.0 / D ** 0.5)
    p['bq'] = jnp.zeros((D,), jnp.float32)
    p['bk'] = jnp.zeros((D,), jnp.float32)
    p['bv'] = jnp.zeros((D,), jnp.float32)
    p['bo'] = jnp.zeros((D,), jnp.float32)
    p['w1'] = n(ks[7], (D, F), 1.0 / D ** 0.5)           # linear1 (in, out)
    p['b1'] = n(ks[8], (F,), 0.02)
    p['w2'] = n(ks[9], (F, D), 1.0 / F ** 0.5)           # linear2 (in, out)
    p['b2'] = n(ks[10], (D,), 0.02)
    for i in (1, 2, 3):                                  # LayerNorm defaults
        p[f'g{i}'] = jnp.ones((D,), jnp.float32)
        p[f'be{i}'] = jnp.zeros((D,), jnp.float32)
    xavier_std = (2.0 / (D + dup)) ** 0.5                # xavier_normal_
    p['dup_pool'] = n(ks[11], (K, D, dup), xavier_std)
    p['dup_bias'] = jnp.zeros((num_classes,), jnp.float32)   # constant_(.., 0)
    return p


def prepare_params(p):
    """One-time conversion into the layouts the kernels consume: bf16 matmul
    operands, heads on a leading axis, (K, dup, D) GroupFC weights (D = lane
    dim), biases as (1, N) rows, class bias zero-padded to K*dup."""
    K, D = p['query'].shape
    hd = D // NHEAD
    dup = p['dup_pool'].shape[2]
    num_classes = p['dup_bias'].shape[0]
    bf = lambda v: v.astype(jnp.bfloat16)
    row = lambda v: v.reshape(1, -1)
    heads_in = lambda w: bf(w).reshape(D, NHEAD, hd).transpose(1, 0, 2)
    heads_b = lambda b: b.reshape(NHEAD, 1, hd)
    bias_pad = jnp.zeros((K * dup,), jnp.float32).at[:num_classes].set(
        p['dup_bias'])
    return {
        'w_e': bf(p['w_e']), 'b_e': row(p['b_e']),
        'query': p['query'], 'g1': row(p['g1']), 'be1': row(p['be1']),
        'wq_h': heads_in(p['wq']), 'bq_h': heads_b(p['bq']),
        'wk_h': heads_in(p['wk']), 'bk_h': heads_b(p['bk']),
        'wv_h': heads_in(p['wv']), 'bv_h': heads_b(p['bv']),
        'wo_h': bf(p['wo']).reshape(NHEAD, hd, D), 'bo': row(p['bo']),
        'g2': row(p['g2']), 'be2': row(p['be2']),
        'g3': row(p['g3']), 'be3': row(p['be3']),
        'w1': bf(p['w1']), 'b1': row(p['b1']),
        'w2': bf(p['w2']), 'b2': row(p['b2']),
        'dup_pool_t': bf(jnp.transpose(p['dup_pool'], (0, 2, 1))),  # (K,dup,D)
        'bias_pad': row(bias_pad),
    }


# --------------------------------------------------------------------------- #
# Full forward (zsl=0 path, eval mode)                                         #
# --------------------------------------------------------------------------- #
def ml_decoder_forward(x, pp, *, num_classes):
    bs, C, H, W = x.shape
    S = H * W

    # x.flatten(2); the (1,2)-transpose is folded into the embed matmul.
    emb = embed_relu(x.reshape(bs, C, S), pp['w_e'], pp['b_e'])  # (bs,S,D) bf16

    tgt1, q3 = query_prep(pp)                    # batch-invariant, computed once
    h = decoder_layer(pp, tgt1, q3, emb)         # (bs, K, D) f32

    out_flat = group_fc(h, pp['dup_pool_t'], pp['bias_pad'])     # (bs, K*dup)
    # matches "out.flatten(1)[:, :num_classes] + bias" (bias padded above).
    return out_flat[:, :num_classes]


# --------------------------------------------------------------------------- #
if __name__ == "__main__":
    # Small-but-consistent configuration (zsl=0 path):
    num_classes = 20
    K = 8            # num_of_groups (embed_len_decoder)
    D = 32           # decoder_embedding
    C = 64           # initial_num_features
    F = 2048         # dim_feedforward (hard-coded in MLDecoder)
    dup = int(num_classes / K + 0.999)     # duplicate_factor = 3
    bs, H, W = 2, 8, 8

    key = jax.random.PRNGKey(0)
    kx, kp = jax.random.split(key)
    x = jax.random.normal(kx, (bs, C, H, W), jnp.float32)
    params = init_params(kp, num_classes=num_classes, K=K, D=D, C=C, F=F, dup=dup)
    pp = prepare_params(params)

    logits = ml_decoder_forward(x, pp, num_classes=num_classes)
    logits = jax.block_until_ready(logits)
    assert logits.shape == (bs, num_classes), logits.shape
    assert bool(jnp.all(jnp.isfinite(logits)))
    print("KERNEL_OK")
</pallas_src>

<mosaic_0001>
module attributes {stable_mosaic.version = 11 : i64} {
  func.func @embed_relu_kernel(%arg0: i32, %arg1: i32, %arg2: memref<1x64x64xf32, #tpu.memory_space<vmem>>, %arg3: memref<64x32xbf16, #tpu.memory_space<vmem>>, %arg4: memref<1x32xf32, #tpu.memory_space<vmem>>, %arg5: memref<1x64x32xbf16, #tpu.memory_space<vmem>>) attributes {dimension_semantics = [#tpu.dimension_semantics<parallel>, #tpu.dimension_semantics<parallel>], iteration_bounds = array<i64: 2, 1>, scalar_prefetch = 0 : i64, scratch_operands = 0 : i64, tpu.core_type = #tpu.core_type<tc>, window_params = [{transform_indices = @transform_0, window_bounds = array<i64: 1, 64, 64>}, {pipeline_mode = #tpu.pipeline_mode<synchronous>, transform_indices = @transform_1, window_bounds = array<i64: 64, 32>}, {pipeline_mode = #tpu.pipeline_mode<synchronous>, transform_indices = @transform_2, window_bounds = array<i64: 1, 32>}, {transform_indices = @transform_3, window_bounds = array<i64: 1, 64, 32>}]} {
    %c0 = arith.constant 0 : index
    %c0_0 = arith.constant 0 : index
    %c0_1 = arith.constant 0 : index
    %0 = vector.load %arg2[%c0, %c0_0, %c0_1] : memref<1x64x64xf32, #tpu.memory_space<vmem>>, vector<1x64x64xf32>
    %1 = vector.shape_cast %0 : vector<1x64x64xf32> to vector<64x64xf32>
    %2 = arith.truncf %1 : vector<64x64xf32> to vector<64x64xbf16>
    %c0_2 = arith.constant 0 : index
    %c0_3 = arith.constant 0 : index
    %3 = vector.load %arg3[%c0_2, %c0_3] : memref<64x32xbf16, #tpu.memory_space<vmem>>, vector<64x32xbf16>
    %cst = arith.constant dense<0.000000e+00> : vector<64x32xf32>
    %4 = tpu.matmul %2, %3, %cst {dimension_numbers = #tpu.dot_dimension_numbers<[0], [0], [1], [1], [0, 1, 1, 1], [], []>} : vector<64x64xbf16>, vector<64x32xbf16>, vector<64x32xf32> -> vector<64x32xf32>
    %c0_4 = arith.constant 0 : index
    %c0_5 = arith.constant 0 : index
    %5 = vector.load %arg4[%c0_4, %c0_5] : memref<1x32xf32, #tpu.memory_space<vmem>>, vector<1x32xf32>
    %6 = vector.broadcast %5 : vector<1x32xf32> to vector<64x32xf32>
    %7 = arith.addf %4, %6 : vector<64x32xf32>
    %cst_6 = arith.constant 0.000000e+00 : f32
    %8 = vector.broadcast %cst_6 : f32 to vector<64x32xf32>
    %9 = arith.maximumf %7, %8 : vector<64x32xf32>
    %10 = arith.truncf %9 : vector<64x32xf32> to vector<64x32xbf16>
    %c0_7 = arith.constant 0 : index
    %c0_8 = arith.constant 0 : index
    %c0_9 = arith.constant 0 : index
    %11 = vector.load %arg5[%c0_7, %c0_8, %c0_9] : memref<1x64x32xbf16, #tpu.memory_space<vmem>>, vector<1x64x32xbf16>
    %12 = vector.shape_cast %11 : vector<1x64x32xbf16> to vector<64x32xbf16>
    %13 = vector.shape_cast %10 : vector<64x32xbf16> to vector<1x64x32xbf16>
    tpu.vector_store %arg5[%c0_7, %c0_8, %c0_9], %13 {strides = array<i32>} : memref<1x64x32xbf16, #tpu.memory_space<vmem>>, vector<1x64x32xbf16>,
    return
  }
  func.func @transform_0(%arg0: i32, %arg1: i32) -> (i32, i32, i32) {
    %c0_i32 = arith.constant 0 : i32
    %c0_i32_0 = arith.constant 0 : i32
    return %arg0, %c0_i32, %arg1 : i32, i32, i32
  }
  func.func @transform_1(%arg0: i32, %arg1: i32) -> (i32, i32) {
    %c0_i32 = arith.constant 0 : i32
    %c0_i32_0 = arith.constant 0 : i32
    %c0_i32_1 = arith.constant 0 : i32
    return %c0_i32, %c0_i32_0 : i32, i32
  }
  func.func @transform_2(%arg0: i32, %arg1: i32) -> (i32, i32) {
    %c0_i32 = arith.constant 0 : i32
    %c0_i32_0 = arith.constant 0 : i32
    %c0_i32_1 = arith.constant 0 : i32
    return %c0_i32, %c0_i32_0 : i32, i32
  }
  func.func @transform_3(%arg0: i32, %arg1: i32) -> (i32, i32, i32) {
    %c0_i32 = arith.constant 0 : i32
    %c0_i32_0 = arith.constant 0 : i32
    return %arg0, %arg1, %c0_i32 : i32, i32, i32
  }
}

</mosaic_0001>

<bundles_post_ra>
// kernel: tpu_custom_call.1
= control target key start
LH: loop header
LB: loop body
LE: loop exit
PB: predicated region body
PF: predicated region fallthrough
CT: control target
= control target key end

     0   :  { %8 = vsyncpa [#allocation3], 0  ;;  %s1191_s0 = inlined_call_operand.hbm [shape: f32[2,64,64], index: 0, kind: input, shape index: {}]   ;;  %s1192_s1 = inlined_call_operand.hbm [shape: bf16[64,32], index: 1, kind: input, shape index: {}]   ;;  %s1193_s2 = inlined_call_operand.hbm [shape: f32[1,32], index: 2, kind: input, shape index: {}]   ;;  %s1194_s3 = inlined_call_operand.hbm [shape: bf16[2,64,32], index: 3, kind: output, shape index: {}]  }
   0x1   :  { %10 = vsyncpa [#allocation3 + $0x1], 0 }
   0x2   :  { %11 = vsyncpa [#allocation6], 0 }
   0x3   :  { %12 = vsyncpa [#allocation4], 0 }
   0x4   :  { %14 = vsyncpa [#allocation4 + $0x1], 0  ;;  %s926_s12 = smov 0   ;;  %s928_s13 = smov 0  }
   0x5   :  { %s930_s14 = smov 0   ;;  %s932_s15 = smov 0  }
   0x6   :  { %s934_s16 = smov 0   ;;  %s936_s17 = smov 0  }
   0x7 LB: > { %s550_s18 = sadd.s32 4294967295, %s894_s17   ;;  %s551_s19 = sadd.s32 4294967294, %s894_s17   ;;  %s894_s17 = sphi %s936_s17, %s20_s17   ;;  %s890_s16 = sphi %s934_s16, %s1216_s16   ;;  %s886_s15 = sphi %s932_s15, %s1215_s15   ;;  %s882_s14 = sphi %s930_s14, %s1214_s14   ;;  %s878_s13 = sphi %s928_s13, %s1213_s13   ;;  %s874_s12 = sphi %s926_s12, %s1212_s12  }
   0x8   : > { %p54_p0 = scmp.ne.s32.totalorder %s878_s13, %s874_s12  ;;  %p960_p1 = scmp.eq.s32.totalorder %s550_s18, 0 }
   0x9   : > { %p964_p2 = scmp.eq.s32.totalorder %s550_s18, 1  ;;  %p128_p3 = scmp.eq.s32.totalorder %s551_s19, 1 }
   0xa   : > { %s1199_s20 = scalar_select %p960_p1, 1, 0 }
   0xb   : > { %p970_p4 = por %p960_p1, %p54_p0  ;;  %p552_p5 = scmp.ge.s32.totalorder %s894_s17, 1 }
   0xc   : > { %p975_p6 = por %p128_p3, %p54_p0  ;;  %p135_p7 = scmp.lt.s32.totalorder %s894_s17, 3 }
   0xd   : > { %s1201_s22 = scalar_select %p970_p4, 1, 0 }
   0xe   : > { %s1202_s23 = scalar_select %p975_p6, 1, 0 }
   0xf   : > { %p980_p8 = pnand %p552_p5, %p135_p7  ;;  %s896_s25 = smov [#allocation5]  }
  0x10   : > { %s147_s26 = sshll.u32 %s896_s25, 4  ;;  %s897_s28 = smov [#allocation7]   ;;  %s984_s26 = int_to_ptr.vmem [resolvable:$true] %s147_s26 }
  0x11   : > { %p640_p9 = pneg %p980_p8  ;;  %s161_s29 = sshll.u32 %s897_s28, 4  ;;  %s995_s29 = int_to_ptr.vmem [resolvable:$true] %s161_s29 }
  0x12   : > { %s722_s5 = scalar_lea.hbm %s1192_s1, 512 }
  0x13   : > { %p991_p11 = pnand %p640_p9, %p960_p1  ;;  %p723_p12 = scmp.ne.s32.totalorder %s1192_s1, %s722_s5 }
  0x14   : > { %p729_p5 = scmp.lt.u32.totalorder %s722_s5, %s1192_s1 }
  0x15   : > { %p724_p13 = pneg %p991_p11 }
  0x17   : > { %p725_p0 = pnand %p724_p13, %p723_p12 }
  0x19   : > { %p726_p3 = pneg %p725_p0 }
  0x1b   : > { %p731_p7 = pnand %p729_p5, %p726_p3 }
  0x1d   : > { %734 = shalt.err (!%p731_p7)
}
  0x1e   : > { %s735_s10 = scalar_lea.vmem %s984_s26, 512  ;;  %p743_p1 = scmp.lt.s32.totalorder %s984_s26, %s984_s26 }
  0x1f   : > { %p736_p9 = scmp.ne.s32.totalorder %s984_s26, %s735_s10  ;;  %p744_p12 = scmp.lt.s32.totalorder %s735_s10, %s735_s10 }
  0x21   : > { %p738_p10 = pnand %p736_p9, %p724_p13  ;;  %p745_p0 = por %p744_p12, %p743_p1 }
  0x23   : > { %p739_p6 = pneg %p738_p10 }
  0x25   : > { %p746_p4 = pnand %p745_p0, %p739_p6 }
  0x27   : > { %749 = shalt.err (!%p746_p4)
}
  0x28   : > { %s898_s11 = smov 64   ;;  %s899_s18 = smov 4  }
  0x29   : > { %643 = dma.hbm_to_vmem [thread:$0]  (!%p991_p11), %s1192_s1, 512, %s984_s26, [#allocation6], %s898_s11, %s898_s11, %s899_s18  }
  0x2a   : > { %s750_s4 = scalar_lea.hbm %s1193_s2, 16 }
  0x2b   : > { %p751_p1 = scmp.ne.s32.totalorder %s1193_s2, %s750_s4  ;;  %p757_p10 = scmp.lt.u32.totalorder %s750_s4, %s1193_s2 }
  0x2d   : > { %p753_p4 = pnand %p751_p1, %p724_p13 }
  0x2f   : > { %p754_p6 = pneg %p753_p4 }
  0x31   : > { %p759_p3 = pnand %p757_p10, %p754_p6 }
  0x33   : > { %762 = shalt.err (!%p759_p3)
}
  0x34   : > { %s763_s26 = scalar_lea.vmem %s995_s29, 16  ;;  %s770_s9 = scalar_lea.vmem %s995_s29, 32 }
  0x35   : > { %p764_p5 = scmp.ne.s32.totalorder %s995_s29, %s763_s26  ;;  %p771_p12 = scmp.lt.s32.totalorder %s995_s29, %s995_s29 }
  0x36   : > { %p772_p0 = scmp.lt.s32.totalorder %s770_s9, %s763_s26 }
  0x37   : > { %p766_p7 = pnand %p764_p5, %p724_p13 }
  0x38   : > { %p773_p1 = por %p772_p0, %p771_p12 }
  0x39   : > { %p767_p9 = pneg %p766_p7 }
  0x3b   : > { %p774_p4 = pnand %p773_p1, %p767_p9 }
  0x3d   : > { %777 = shalt.err (!%p774_p4)
}
  0x3e   : > { %646 = dma.hbm_to_vmem [thread:$0]  (!%p991_p11), %s1193_s2, 16, %s995_s29, [#allocation6]  }
  0x3f   : > { %s32_s18 = sadd.s32 1, %s890_s16  ;;  %s41_s19 = sadd.s32 1, %s882_s14 }
  0x40   : > { %p34_p13 = scmp.ge.s32.totalorder %s32_s18, 2  ;;  %p48_p6 = scmp.ne.s32.totalorder %s882_s14, %s878_s13 }
  0x41   : > { %p49_p10 = scmp.eq.s32.totalorder %s894_s17, 0  ;;  %p657_p3 = scmp.lt.s32.totalorder %s894_s17, 2 }
  0x42   : > { %s1218_s18 = smov (%p34_p13, %s32_s18), 0  ;;  %p1060_p7 = por %p964_p2, %p48_p6 }
  0x43   : > { %p50_p5 = por %p49_p10, %p48_p6  ;;  %s36_s25 = ssub.s32 %s890_s16, %s1218_s18 }
  0x44   : > { %s1205_s27 = scalar_select %p1060_p7, 1, 0 }
  0x45   : > { %s172_s28 = sand.u32 1, %s882_s14   ;;  %p39_p9 = scmp.eq.s32.totalorder %s36_s25, 0 }
  0x46   : > { %s556_s29 = sshll.u32 %s172_s28, 6  ;;  %s586_s30 = sshll.u32 %s890_s16, 10 }
  0x47   : > { %s1069_s4 = scalar_select %p39_p9, %s882_s14, %s41_s19  }
  0x48   : > { %s1074_s7 = scalar_lea.hbm %s1191_s0, %s586_s30  ;;  %s176_s21 = scalar_lea.vmem [#allocation2], %s556_s29 }
  0x49   : > { %s184_s8 = sshll.u32 %s176_s21, 4  ;;  %p1078_p2 = pnand %p657_p3, %p50_p5  ;;  %s1082_s8 = int_to_ptr.vmem [resolvable:$true] %s184_s8 }
  0x4a   : > { %s1084_s9 = scalar_lea.sflag [#allocation3], %s172_s28  ;;  %s778_s10 = scalar_lea.hbm %s1074_s7, 1024 }
  0x4b   : > { %p779_p11 = scmp.ne.s32.totalorder %s1074_s7, %s778_s10  ;;  %p780_p12 = pneg %p1078_p2 }
  0x4c   : > { %s783_s25 = scalar_lea.hbm %s1191_s0, 2048  ;;  %p784_p4 = scmp.lt.u32.totalorder %s1074_s7, %s1191_s0 }
  0x4d   : > { %p781_p0 = pnand %p780_p12, %p779_p11  ;;  %p785_p13 = scmp.lt.u32.totalorder %s783_s25, %s778_s10 }
  0x4e   : > { %p787_p10 = scmp.lt.u32.totalorder %s778_s10, %s1074_s7 }
  0x4f   : > { %p782_p1 = pneg %p781_p0  ;;  %p786_p6 = por %p785_p13, %p784_p4 }
  0x51   : > { %p788_p3 = por %p787_p10, %p786_p6 }
  0x53   : > { %p789_p5 = pnand %p788_p3, %p782_p1 }
  0x55   : > { %792 = shalt.err (!%p789_p5)
}
  0x56   : > { %s793_s28 = scalar_lea.vmem %s1082_s8, 1024  ;;  %s900_s5 = smov [#allocation2]  }
  0x57   : > { %p794_p9 = scmp.ne.s32.totalorder %s1082_s8, %s793_s28  ;;  %s798_s6 = sshll.u32 %s900_s5, 4  ;;  %s799_s6 = int_to_ptr.vmem [resolvable:$false] %s798_s6 }
  0x58   : > { %s800_s21 = scalar_lea.vmem %s799_s6, 2048  ;;  %p801_p7 = scmp.lt.s32.totalorder %s1082_s8, %s799_s6 }
  0x59   : > { %p796_p11 = pnand %p794_p9, %p780_p12  ;;  %p802_p4 = scmp.lt.s32.totalorder %s800_s21, %s793_s28 }
  0x5b   : > { %p797_p0 = pneg %p796_p11  ;;  %p803_p13 = por %p802_p4, %p801_p7 }
  0x5d   : > { %p804_p6 = pnand %p803_p13, %p797_p0 }
  0x5f   : > { %807 = shalt.err (!%p804_p6)
}
  0x60   : > { %s901_s10 = smov 128   ;;  %s902_s11 = smov 8  }
  0x61   : > { %650 = dma.hbm_to_vmem [thread:$0]  (!%p1078_p2), %s1074_s7, 1024, %s1082_s8, %s1084_s9, %s901_s10, %s901_s10, %s902_s11  }
  0x62   : > { %196 = sbr.rel (%p980_p8) target bundleno = 463 (0x1cf), region = 32  ;;  %s1115_s19 = sand.u32 (!%p980_p8), 1, %s878_s13  }
  0x63   : > { %s560_s25 = sshll.u32 (!%p980_p8), %s1115_s19, 6  ;;  %s199_s29 = scalar_lea.sflag (!%p980_p8), [#allocation3], %s1115_s19 }
  0x64   : > { %s202_s30 = scalar_lea.vmem (!%p980_p8), [#allocation2], %s560_s25  ;;  %p1207_p7 = scmp.ne.s32.totalorder (!%p980_p8), %s1201_s22, 0 }
  0x69   : > { %861 = dma.done.wait (%p1207_p7), %s199_s29, 1024  }
  0x6a   : > { %863 = vsyncadd (%p1207_p7), %s199_s29, 4294966272  ;;  %p1208_p12 = scmp.ne.s32.totalorder %s1199_s20, 0 }
  0x6c   : > { %865 = dma.done.wait (%p1208_p12), [#allocation6], 528  }
  0x6d   : > { %867 = vsyncadd (%p1208_p12), [#allocation6], 4294966768  ;;  %v235_v0 = vld [vmem:[%s202_s30] sm:$0xff]  ;;  %v236_v1 = vld [vmem:[%s202_s30 + $0x8] sm:$0xff]  ;;  %vm302_vm0 = vcmask 523264   ;;  %s563_s20 = sshll.u32 %s1115_s19, 5 }
  0x6e   : > { %v237_v2 = vld [vmem:[%s202_s30 + $0x10] sm:$0xff]  ;;  %v243_v3 = vpack.c.bf16 %v236_v1, %v235_v0  ;;  %v238_v4 = vld [vmem:[%s202_s30 + $0x18] sm:$0xff]  ;;  %v239_v5 = vld [vmem:[%s202_s30 + $0x20] sm:$0xff]  ;;  %vm420_vm1 = vcmask 257024   ;;  %s232_s22 = scalar_lea.vmem [#allocation8], %s563_s20  ;;  %s595_s24 = sshll.u32 %s886_s15, 9 }
  0x6f   : > { %v240_v6 = vld [vmem:[%s202_s30 + $0x28] sm:$0xff]  ;;  %v244_v7 = vpack.c.bf16 %v238_v4, %v237_v2  ;;  %v718_v8 = vld [vmem:[#allocation5] sm:$0xff]   ;;  %v720_v11 = vld [vmem:[#allocation5 + $0x10] sm:$0xff]   ;;  %s445_s7 = sshll.u32 %s232_s22, 4  ;;  %s1137_s9 = scalar_lea.hbm %s1194_s3, %s595_s24  ;;  %s1139_s7 = int_to_ptr.vmem [resolvable:$true] %s445_s7 }
  0x70   : > { %262 = vxpose.xlu0.c.b16.start [1/4] (short) (narrow) %v243_v3, 64  ;;  %v719_v9 = vld [vmem:[#allocation5 + $0x8] sm:$0xff]   ;;  %604 = vmatprep.subr.bf16.mxu0 %v718_v8  ;;  %v245_v10 = vpack.c.bf16 %v240_v6, %v239_v5  ;;  %v241_v12 = vld [vmem:[%s202_s30 + $0x30] sm:$0xff]  ;;  %v242_v13 = vld [vmem:[%s202_s30 + $0x38] sm:$0xff]  ;;  %s430_s15 = scalar_lea.sflag [#allocation4], %s1115_s19  ;;  %s808_s28 = scalar_lea.vmem %s1139_s7, 512 }
  0x71   : > { %620 = vmatprep.subr.bf16.mxu1 %v718_v8  ;;  %605 = vmatpush3.bf16.msra.mxu0 %v718_v8  ;;  %v246_v14 = vpack.c.bf16 %v242_v13, %v241_v12  ;;  %v721_v15 = vld [vmem:[#allocation5 + $0x18] sm:$0xff]   ;;  %v564_v20 = vld [vmem:[#allocation7] ss:$0 sm:$0xff]  ;;  %p809_p8 = scmp.ne.s32.totalorder %s1139_s7, %s808_s28  ;;  %p1209_p2 = scmp.ne.s32.totalorder %s1205_s27, 0 }
  0x72   : > { %624 = vmatpush3.bf16.msra.mxu1 %v718_v8  ;;  %606 = vmatprep.subr.bf16.mxu0 %v719_v9  ;;  %s903_s5 = smov [#allocation8]  }
  0x73   : > { %621 = vmatprep.subr.bf16.mxu1 %v719_v9  ;;  %p810_p1 = pnand %p809_p8, %p1209_p2  ;;  %s812_s6 = sshll.u32 %s903_s5, 4  ;;  %s813_s6 = int_to_ptr.vmem [resolvable:$false] %s812_s6 }
  0x74   : > { %263 = vxpose.xlu0.c.b16.cont [2/4] (short) (narrow) %v244_v7, 64  ;;  %s814_s21 = scalar_lea.vmem %s813_s6, 1024  ;;  %p815_p3 = scmp.lt.s32.totalorder %s1139_s7, %s813_s6 }
  0x75   : > { %607 = vmatpush3.bf16.msra.mxu0 %v719_v9  ;;  %p811_p10 = pneg %p810_p1  ;;  %p816_p5 = scmp.lt.s32.totalorder %s814_s21, %s808_s28 }
  0x76   : > { %625 = vmatpush3.bf16.msra.mxu1 %v719_v9  ;;  %608 = vmatprep.subr.bf16.mxu0 %v720_v11 }
  0x77   : > { %622 = vmatprep.subr.bf16.mxu1 %v720_v11  ;;  %p817_p9 = por %p816_p5, %p815_p3 }
  0x78   : > { %264 = vxpose.xlu0.c.b16.cont [3/4] (short) (narrow) %v245_v10, 64 }
  0x79   : > { %609 = vmatpush3.bf16.msra.mxu0 %v720_v11  ;;  %p818_p11 = pnand %p817_p9, %p811_p10 }
  0x7a   : > { %626 = vmatpush3.bf16.msra.mxu1 %v720_v11  ;;  %610 = vmatprep.subr.bf16.mxu0 %v721_v15 }
  0x7b   : > { %623 = vmatprep.subr.bf16.mxu1 %v721_v15 }
  0x7c   : > { %265 = vxpose.xlu0.c.b16.end [4/4] (short) (narrow) %v246_v14, 64 }
  0x7d   : > { %611 = vmatpush3.bf16.msra.mxu0 %v721_v15 }
  0x7e   : > { %627 = vmatpush3.bf16.msra.mxu1 %v721_v15 }
  0xd6   : > { %v270_v16 = vpop.trf.xlu0 }
  0xd7   : > { %612 = vmatprep.mubr.msk.bf16.mxu0 %vm302_vm0, %v270_v16 }
  0xda   : > { %v271_v17 = vpop.trf.xlu0 }
  0xdb   : > { %613 = vmatmul.mubr.msk.bf16.vlgmr.msra.gmra.mrb[0].mxu0 %vm302_vm0, %v271_v17 }
  0xde   : > { %v272_v18 = vpop.trf.xlu0 }
  0xdf   : > { %616 = vmatprep.mubr.msk.bf16.mxu1 %vm302_vm0, %v272_v18 }
  0xe2   : > { %v273_v19 = vpop.trf.xlu0 }
  0xe3   : > { %617 = vmatmul.mubr.msk.bf16.vlgmr.msra.gmra.mrb[0].mxu1 %vm302_vm0, %v273_v19 }
 0x1ae   : > { %v614_v21 = vpop.f32.mrb[0].mxu0 }
 0x1af   : > { %v358_v22 = vadd.f32 %v614_v21, %v564_v20  ;;  %v349_v23 = vpop.f32.mrb[1].mxu0 }
 0x1b0   : > { %v350_v24 = vadd.f32 %v564_v20, %v349_v23  ;;  %v615_v25 = vpop.f32.mrb[2].mxu0 }
 0x1b1   : > { %v382_v26 = vmax.f32 %v358_v22, 0.0  ;;  %v361_v27 = vadd.f32 %v615_v25, %v564_v20  ;;  %v352_v28 = vpop.f32.mrb[3].mxu0 }
 0x1b2   : > { %v380_v29 = vmax.f32 %v350_v24, 0.0  ;;  %v353_v30 = vadd.f32 %v564_v20, %v352_v28 }
 0x1b3   : > { %v589_v31 = vpack.c.bf16 %v382_v26, %v382_v26  ;;  %v383_v32 = vmax.f32 %v361_v27, 0.0 }
 0x1b4   : > { %v587_v33 = vpack.c.bf16 %v380_v29, %v380_v29  ;;  %v381_v34 = vmax.f32 %v353_v30, 0.0 }
 0x1b5   : > { %423 = vst.msk [vmem:[%s232_s22 + $0x8] sm:$0xf] %vm420_vm1, %v589_v31  ;;  %v590_v35 = vpack.c.bf16 %v383_v32, %v383_v32 }
 0x1b6   : > { %421 = vst.msk [vmem:[%s232_s22] sm:$0xf] %vm420_vm1, %v587_v33  ;;  %v588_v36 = vpack.c.bf16 %v381_v34, %v381_v34  ;;  %v618_v37 = vpop.f32.mrb[0].mxu1 }
 0x1b7   : > { %424 = vst.msk [vmem:[%s232_s22 + $0xc] sm:$0xf] %vm420_vm1, %v590_v35  ;;  %v374_v38 = vadd.f32 %v618_v37, %v564_v20  ;;  %v365_v39 = vpop.f32.mrb[1].mxu1 }
 0x1b8   : > { %422 = vst.msk [vmem:[%s232_s22 + $0x4] sm:$0xf] %vm420_vm1, %v588_v36  ;;  %v366_v40 = vadd.f32 %v564_v20, %v365_v39  ;;  %v619_v41 = vpop.f32.mrb[2].mxu1 }
 0x1b9   : > { %v386_v42 = vmax.f32 %v374_v38, 0.0  ;;  %v377_v43 = vadd.f32 %v619_v41, %v564_v20  ;;  %v368_v44 = vpop.f32.mrb[3].mxu1 }
 0x1ba   : > { %v384_v45 = vmax.f32 %v366_v40, 0.0  ;;  %v369_v46 = vadd.f32 %v564_v20, %v368_v44 }
 0x1bb   : > { %v593_v47 = vpack.c.bf16 %v386_v42, %v386_v42  ;;  %v387_v48 = vmax.f32 %v377_v43, 0.0 }
 0x1bc   : > { %v591_v49 = vpack.c.bf16 %v384_v45, %v384_v45  ;;  %v385_v50 = vmax.f32 %v369_v46, 0.0 }
 0x1bd   : > { %427 = vst.msk [vmem:[%s232_s22 + $0x18] sm:$0xf] %vm420_vm1, %v593_v47  ;;  %v594_v51 = vpack.c.bf16 %v387_v48, %v387_v48 }
 0x1be   : > { %425 = vst.msk [vmem:[%s232_s22 + $0x10] sm:$0xf] %vm420_vm1, %v591_v49  ;;  %v592_v52 = vpack.c.bf16 %v385_v50, %v385_v50 }
 0x1bf   : > { %428 = vst.msk [vmem:[%s232_s22 + $0x1c] sm:$0xf] %vm420_vm1, %v594_v51 }
 0x1c0   : > { %426 = vst.msk [vmem:[%s232_s22 + $0x14] sm:$0xf] %vm420_vm1, %v592_v52 }
 0x1c1   : > { %821 = shalt.err (!%p818_p11)
}
 0x1c2   : > { %s822_s10 = scalar_lea.hbm %s1137_s9, 512  ;;  %s826_s29 = scalar_lea.hbm %s1194_s3, 1024 }
 0x1c3   : > { %p823_p0 = scmp.ne.s32.totalorder %s1137_s9, %s822_s10  ;;  %p827_p6 = scmp.lt.u32.totalorder %s1137_s9, %s1194_s3 }
 0x1c4   : > { %p828_p7 = scmp.lt.u32.totalorder %s826_s29, %s822_s10  ;;  %p830_p8 = scmp.lt.u32.totalorder %s822_s10, %s1137_s9 }
 0x1c5   : > { %p824_p4 = pnand %p823_p0, %p1209_p2 }
 0x1c6   : > { %p829_p12 = por %p828_p7, %p827_p6 }
 0x1c7   : > { %p825_p13 = pneg %p824_p4 }
 0x1c8   : > { %p831_p1 = por %p830_p8, %p829_p12 }
 0x1ca   : > { %p832_p10 = pnand %p831_p1, %p825_p13 }
 0x1cc   : > { %835 = shalt.err (!%p832_p10)
}
 0x1cd   : > { %s904_s22 = smov 64   ;;  %s905_s24 = smov 4  }
 0x1ce   : > { %638 = dma.vmem_to_hbm [thread:$0]  (%p1209_p2), %s1139_s7, 512, %s1137_s9, %s430_s15, %s904_s22, %s904_s22, %s905_s24  }
 0x1cf PF: > { %s460_s8 = sand.u32 1, %s874_s12   ;;  %p1210_p3 = scmp.ne.s32.totalorder %s1202_s23, 0 }
 0x1d0   : > { %p1211_p5 = scmp.ge.s32.totalorder %s894_s17, 2  ;;  %s461_s26 = scalar_lea.sflag [#allocation4], %s460_s8 }
 0x1d2   : > { %p652_p9 = pnand %p1211_p5, %p1210_p3 }
 0x1d4   : > { %869 = dma.done.wait (!%p652_p9), %s461_s26, 512  }
 0x1d5   : > { %871 = vsyncadd (!%p652_p9), %s461_s26, 4294966784  ;;  %s20_s17 = sadd.s32 1, %s894_s17   ;;  %s1212_s12 = smov %s878_s13 }
 0x1d6   : > { %p17_p11 = scmp.ge.s32.totalorder %s20_s17, 4   ;;  %s1213_s13 = smov %s882_s14 }
 0x1d7   : > { %s1214_s14 = smov %s1069_s4  ;;  %s1215_s15 = smov %s890_s16 }
 0x1d8   : > { %s1216_s16 = smov %s1218_s18  ;;  %19 = sbr.rel (!%p17_p11) target bundleno = 7 (0x7), region = 85 }
 0x1df   :  { %466 = vsyncpa [#allocation3], 1 }
 0x1e0   :  { %468 = vsyncpa [#allocation3 + $0x1], 1 }
 0x1e1   :  { %469 = vsyncpa [#allocation6], 1 }
 0x1e2   :  { %470 = vsyncpa [#allocation4], 1 }
 0x1e3   :  { %472 = vsyncpa [#allocation4 + $0x1], 1 }

</bundles_post_ra>
